<compile_context>
chip_gen: v6e
topology: v6e:2x2x1
jax: 0.10.0
libtpu: 0.0.40
codegen_flags: <defaults>
</compile_context>

<pallas_src>
import functools

import numpy as np
import jax
import jax.numpy as jnp
from jax import lax
from jax.experimental import pallas as pl
from jax.experimental.pallas import tpu as pltpu

# ---- module hyperparameters (static, from LagrangeInterp.__init__) ----
M_DIM = 2                      # interp_dim
DEGREE = 2                     # interp_degree
MESH_BOUND = ((0.0, 0.0), (1.0, 1.0))
MESH_SIZE = (8, 8)             # -> interp_coe shape (8*2+1, 8*2+1) = (17, 17)

C_PAD = 32                     # padded coefficient-index range (>= 17, multiple of 8)
CHUNK = 256                    # points per inner-loop iteration (lane axis, mult of 128)
MAX_TILE_CHUNKS = 8            # at most 8*256 = 2048 points per grid step


def _round_up(x, m):
    return ((x + m - 1) // m) * m


def _interp_kernel(pts_ref, coe_ref, out_ref, *, d, lb, scale, clamp_hi, mesh_size,
                   chunks_per_tile):
    # Invariants hoisted out of the inner loop (JAX does not CSE broadcasts/iota).
    coe_t = coe_ref[...]                                              # [C_PAD, C_PAD]
    sub = lax.broadcasted_iota(jnp.int32, (C_PAD, CHUNK), 0)          # coe index / sublane

    @pl.loop(0, chunks_per_tile, unroll=True)
    def _(c):
        r0 = pl.multiple_of(c * CHUNK, CHUNK)

        def selector(dim):
            # lane-dense per-point prep for one spatial dimension: [1, CHUNK] rows
            x = pts_ref[dim:dim + 1, pl.ds(r0, CHUNK)].astype(jnp.float32)
            t = jnp.clip((x - lb[dim]) * scale[dim], 0.0, clamp_hi[dim])
            e = jnp.minimum(jnp.floor(t), float(mesh_size[dim] - 1))  # robust element clamp
            s = (t - e) * float(d)                                    # local coord in [0, d]
            base = e.astype(jnp.int32) * d                            # first coe index

            # Lagrange basis L_j(s) on nodes 0..d   (each [1, CHUNK])
            basis = []
            for j in range(d + 1):
                val = jnp.ones_like(s)
                for k in range(d + 1):
                    if k != j:
                        val = val * ((s - float(k)) * (1.0 / float(j - k)))
                basis.append(val)

            # sel[a, p] = L_{a - base[p]}(s[p]) if 0 <= a - base[p] <= d else 0
            rel = sub - base                                          # sublane broadcast
            sel = jnp.where(rel == 0, basis[0], 0.0)
            for j in range(1, d + 1):
                sel = jnp.where(rel == j, basis[j], sel)
            return sel                                                # [C_PAD, CHUNK]

        sel0 = selector(0)
        sel1 = selector(1)

        # out[p] = sum_{a,b} sel0[a,p] * coe[a,b] * sel1[b,p]
        #        = sum_b (coe^T @ sel0)[b,p] * sel1[b,p]        (coe passed pre-transposed)
        m = jnp.dot(coe_t, sel0, preferred_element_type=jnp.float32)  # [C_PAD, CHUNK]
        row = jnp.sum(m * sel1, axis=0, keepdims=True)                # [1, CHUNK]

        out_ref[:, pl.ds(r0, CHUNK)] = row                            # lane-dense store


def lagrange_interp_forward(inputs, interp_coe):
    """inputs: [..., m] float array; interp_coe: (mesh_size*d+1,)*m coefficients."""
    size = inputs.shape
    assert size[-1] == M_DIM, "kernel specialized to interp_dim = 2"
    assert interp_coe.shape[0] <= C_PAD and interp_coe.shape[1] <= C_PAD

    pts = inputs.reshape(-1, M_DIM).astype(jnp.float32)
    n = pts.shape[0]

    # adaptive tiling: >= 2 grid steps when possible (v7x megacore), minimal padding
    n_chunks = _round_up(n, CHUNK) // CHUNK
    chunks_per_tile = max(1, min(MAX_TILE_CHUNKS, n_chunks // 2))
    tile_n = chunks_per_tile * CHUNK
    n_pad = _round_up(n, tile_n)
    grid = n_pad // tile_n

    # point index on the LANE axis: single [2, n_pad] input stream
    pts_t = jnp.pad(pts, ((0, n_pad - n), (0, 0))).T

    # pre-transposed, zero-padded coefficient table: coe_t[b, a] = coe[a, b]
    coe_t = jnp.zeros((C_PAD, C_PAD), jnp.float32)
    coe_t = coe_t.at[: interp_coe.shape[1], : interp_coe.shape[0]].set(
        interp_coe.astype(jnp.float32).T
    )

    mb = np.array(MESH_BOUND, dtype=np.float64).reshape(2, M_DIM)
    ms = np.array(MESH_SIZE, dtype=np.float64).reshape(M_DIM)
    lb = tuple(float(v) for v in mb[0])
    scale = tuple(float(v) for v in (ms / (mb[1] - mb[0])))
    clamp_hi = tuple(float(v) for v in (ms - 1e-6))
    ms_i = tuple(int(v) for v in MESH_SIZE)

    kernel = functools.partial(
        _interp_kernel, d=DEGREE, lb=lb, scale=scale, clamp_hi=clamp_hi,
        mesh_size=ms_i, chunks_per_tile=chunks_per_tile,
    )

    out = pl.pallas_call(
        kernel,
        out_shape=jax.ShapeDtypeStruct((1, n_pad), jnp.float32),
        grid_spec=pltpu.PrefetchScalarGridSpec(
            num_scalar_prefetch=0,
            grid=(grid,),
            in_specs=[
                pl.BlockSpec((M_DIM, tile_n), lambda i: (0, i)),
                pl.BlockSpec((C_PAD, C_PAD), lambda i: (0, 0)),
            ],
            out_specs=pl.BlockSpec((1, tile_n), lambda i: (0, i)),
        ),
        compiler_params=pltpu.CompilerParams(
            dimension_semantics=("parallel",)
        ),
    )(pts_t, coe_t)

    return out.reshape(-1)[:n].reshape(size[:-1])


def _ref_forward(inputs, interp_coe):
    """Pure NumPy reference of aTEAM lagrangeinterp (m=2)."""
    pts = np.asarray(inputs, dtype=np.float32).reshape(-1, M_DIM)
    coe = np.asarray(interp_coe, dtype=np.float64)
    mb = np.array(MESH_BOUND, dtype=np.float64).reshape(2, M_DIM)
    ms = np.array(MESH_SIZE, dtype=np.float64).reshape(M_DIM)
    scale = (ms / (mb[1] - mb[0])).astype(np.float32)
    t = (pts - mb[0].astype(np.float32)) * scale
    t = np.minimum(np.maximum(t, np.float32(0.0)), (ms - 1e-6).astype(np.float32))
    e = np.floor(t).astype(np.int64)
    s = (t.astype(np.float64) - e) * DEGREE
    n = pts.shape[0]
    out = np.zeros(n, dtype=np.float64)
    for j0 in range(DEGREE + 1):
        for j1 in range(DEGREE + 1):
            L0 = np.ones(n)
            L1 = np.ones(n)
            for k in range(DEGREE + 1):
                if k != j0:
                    L0 *= (s[:, 0] - k) / (j0 - k)
                if k != j1:
                    L1 *= (s[:, 1] - k) / (j1 - k)
            out += L0 * L1 * coe[e[:, 0] * DEGREE + j0, e[:, 1] * DEGREE + j1]
    return out.reshape(np.asarray(inputs).shape[:-1])


if __name__ == "__main__":
    key = jax.random.PRNGKey(0)
    k_coe, k_pts = jax.random.split(key)

    # interp_coe ~ N(0,1), shape mesh_size*d + 1 (as in nn.Parameter(...).normal_())
    coe_shape = tuple(int(s * DEGREE + 1) for s in MESH_SIZE)        # (17, 17)
    interp_coe = jax.random.normal(k_coe, coe_shape, dtype=jnp.float32)

    # query points [..., m]; slightly outside the mesh bound to exercise clamping
    inputs = jax.random.uniform(
        k_pts, (2, 16, 16, M_DIM), dtype=jnp.float32, minval=-0.1, maxval=1.1
    )

    out = lagrange_interp_forward(inputs, interp_coe)
    out = jax.block_until_ready(out)

    assert out.shape == inputs.shape[:-1]
    ref = _ref_forward(np.asarray(inputs), np.asarray(interp_coe))
    np.testing.assert_allclose(np.asarray(out), ref, rtol=1e-4, atol=1e-4)

    print("KERNEL_OK")
</pallas_src>

<mosaic_0001>
module attributes {stable_mosaic.version = 11 : i64} {
  func.func @_interp_kernel(%arg0: i32, %arg1: memref<2x256xf32, #tpu.memory_space<vmem>>, %arg2: memref<32x32xf32, #tpu.memory_space<vmem>>, %arg3: memref<1x256xf32, #tpu.memory_space<vmem>>) attributes {dimension_semantics = [#tpu.dimension_semantics<parallel>], iteration_bounds = array<i64: 2>, scalar_prefetch = 0 : i64, scratch_operands = 0 : i64, tpu.core_type = #tpu.core_type<tc>, window_params = [{transform_indices = @transform_0, window_bounds = array<i64: 2, 256>}, {pipeline_mode = #tpu.pipeline_mode<synchronous>, transform_indices = @transform_1, window_bounds = array<i64: 32, 32>}, {transform_indices = @transform_2, window_bounds = array<i64: 1, 256>}]} {
    %c0 = arith.constant 0 : index
    %c0_0 = arith.constant 0 : index
    %0 = vector.load %arg2[%c0, %c0_0] : memref<32x32xf32, #tpu.memory_space<vmem>>, vector<32x32xf32>
    %1 = tpu.iota {dimensions = array<i32: 0>} : vector<32x256xi32>
    %c0_i32 = arith.constant 0 : i32
    %c1_i32 = arith.constant 1 : i32
    %2 = arith.muli %c0_i32, %c1_i32 : i32
    %c0_i32_1 = arith.constant 0 : i32
    %3 = arith.addi %c0_i32_1, %2 : i32
    %c256_i32 = arith.constant 256 : i32
    %4 = arith.muli %3, %c256_i32 : i32
    %5 = tpu.assume_multiple %4, 256 : i32
    %c0_2 = arith.constant 0 : index
    %6 = arith.index_cast %5 : i32 to index
    %7 = vector.load %arg1[%c0_2, %6] : memref<2x256xf32, #tpu.memory_space<vmem>>, vector<1x256xf32>
    %cst = arith.constant 0.000000e+00 : f32
    %8 = vector.broadcast %cst : f32 to vector<1x256xf32>
    %9 = arith.subf %7, %8 : vector<1x256xf32>
    %cst_3 = arith.constant 8.000000e+00 : f32
    %10 = vector.broadcast %cst_3 : f32 to vector<1x256xf32>
    %11 = arith.mulf %9, %10 : vector<1x256xf32>
    %cst_4 = arith.constant 0.000000e+00 : f32
    %cst_5 = arith.constant 7.99999904 : f32
    %12 = vector.broadcast %cst_4 : f32 to vector<1x256xf32>
    %13 = arith.maximumf %12, %11 : vector<1x256xf32>
    %14 = vector.broadcast %cst_5 : f32 to vector<1x256xf32>
    %15 = arith.minimumf %14, %13 : vector<1x256xf32>
    %16 = math.floor %15 : vector<1x256xf32>
    %cst_6 = arith.constant 7.000000e+00 : f32
    %17 = vector.broadcast %cst_6 : f32 to vector<1x256xf32>
    %18 = arith.minimumf %16, %17 : vector<1x256xf32>
    %19 = arith.subf %15, %18 : vector<1x256xf32>
    %cst_7 = arith.constant 2.000000e+00 : f32
    %20 = vector.broadcast %cst_7 : f32 to vector<1x256xf32>
    %21 = arith.mulf %19, %20 : vector<1x256xf32>
    %22 = arith.fptosi %18 : vector<1x256xf32> to vector<1x256xi32>
    %c2_i32 = arith.constant 2 : i32
    %23 = vector.broadcast %c2_i32 : i32 to vector<1x256xi32>
    %24 = arith.muli %22, %23 : vector<1x256xi32>
    %cst_8 = arith.constant 1.000000e+00 : f32
    %25 = vector.broadcast %cst_8 : f32 to vector<1x256xf32>
    %cst_9 = arith.constant 1.000000e+00 : f32
    %26 = vector.broadcast %cst_9 : f32 to vector<1x256xf32>
    %27 = arith.subf %21, %26 : vector<1x256xf32>
    %cst_10 = arith.constant -1.000000e+00 : f32
    %28 = vector.broadcast %cst_10 : f32 to vector<1x256xf32>
    %29 = arith.mulf %27, %28 : vector<1x256xf32>
    %30 = arith.mulf %25, %29 : vector<1x256xf32>
    %cst_11 = arith.constant 2.000000e+00 : f32
    %31 = vector.broadcast %cst_11 : f32 to vector<1x256xf32>
    %32 = arith.subf %21, %31 : vector<1x256xf32>
    %cst_12 = arith.constant -5.000000e-01 : f32
    %33 = vector.broadcast %cst_12 : f32 to vector<1x256xf32>
    %34 = arith.mulf %32, %33 : vector<1x256xf32>
    %35 = arith.mulf %30, %34 : vector<1x256xf32>
    %cst_13 = arith.constant 1.000000e+00 : f32
    %36 = vector.broadcast %cst_13 : f32 to vector<1x256xf32>
    %cst_14 = arith.constant 0.000000e+00 : f32
    %37 = vector.broadcast %cst_14 : f32 to vector<1x256xf32>
    %38 = arith.subf %21, %37 : vector<1x256xf32>
    %cst_15 = arith.constant 1.000000e+00 : f32
    %39 = vector.broadcast %cst_15 : f32 to vector<1x256xf32>
    %40 = arith.mulf %38, %39 : vector<1x256xf32>
    %41 = arith.mulf %36, %40 : vector<1x256xf32>
    %cst_16 = arith.constant 2.000000e+00 : f32
    %42 = vector.broadcast %cst_16 : f32 to vector<1x256xf32>
    %43 = arith.subf %21, %42 : vector<1x256xf32>
    %cst_17 = arith.constant -1.000000e+00 : f32
    %44 = vector.broadcast %cst_17 : f32 to vector<1x256xf32>
    %45 = arith.mulf %43, %44 : vector<1x256xf32>
    %46 = arith.mulf %41, %45 : vector<1x256xf32>
    %cst_18 = arith.constant 1.000000e+00 : f32
    %47 = vector.broadcast %cst_18 : f32 to vector<1x256xf32>
    %cst_19 = arith.constant 0.000000e+00 : f32
    %48 = vector.broadcast %cst_19 : f32 to vector<1x256xf32>
    %49 = arith.subf %21, %48 : vector<1x256xf32>
    %cst_20 = arith.constant 5.000000e-01 : f32
    %50 = vector.broadcast %cst_20 : f32 to vector<1x256xf32>
    %51 = arith.mulf %49, %50 : vector<1x256xf32>
    %52 = arith.mulf %47, %51 : vector<1x256xf32>
    %cst_21 = arith.constant 1.000000e+00 : f32
    %53 = vector.broadcast %cst_21 : f32 to vector<1x256xf32>
    %54 = arith.subf %21, %53 : vector<1x256xf32>
    %cst_22 = arith.constant 1.000000e+00 : f32
    %55 = vector.broadcast %cst_22 : f32 to vector<1x256xf32>
    %56 = arith.mulf %54, %55 : vector<1x256xf32>
    %57 = arith.mulf %52, %56 : vector<1x256xf32>
    %58 = vector.broadcast %24 : vector<1x256xi32> to vector<32x256xi32>
    %59 = arith.subi %1, %58 : vector<32x256xi32>
    %c0_i32_23 = arith.constant 0 : i32
    %60 = vector.broadcast %c0_i32_23 : i32 to vector<32x256xi32>
    %61 = arith.cmpi eq, %59, %60 : vector<32x256xi32>
    %cst_24 = arith.constant 0.000000e+00 : f32
    %62 = vector.shape_cast %35 : vector<1x256xf32> to vector<1x256xf32>
    %63 = vector.broadcast %62 : vector<1x256xf32> to vector<32x256xf32>
    %64 = vector.broadcast %cst_24 : f32 to vector<32x256xf32>
    %65 = arith.select %61, %63, %64 : vector<32x256xi1>, vector<32x256xf32>
    %c1_i32_25 = arith.constant 1 : i32
    %66 = vector.broadcast %c1_i32_25 : i32 to vector<32x256xi32>
    %67 = arith.cmpi eq, %59, %66 : vector<32x256xi32>
    %68 = vector.shape_cast %46 : vector<1x256xf32> to vector<1x256xf32>
    %69 = vector.broadcast %68 : vector<1x256xf32> to vector<32x256xf32>
    %70 = arith.select %67, %69, %65 : vector<32x256xi1>, vector<32x256xf32>
    %c2_i32_26 = arith.constant 2 : i32
    %71 = vector.broadcast %c2_i32_26 : i32 to vector<32x256xi32>
    %72 = arith.cmpi eq, %59, %71 : vector<32x256xi32>
    %73 = vector.shape_cast %57 : vector<1x256xf32> to vector<1x256xf32>
    %74 = vector.broadcast %73 : vector<1x256xf32> to vector<32x256xf32>
    %75 = arith.select %72, %74, %70 : vector<32x256xi1>, vector<32x256xf32>
    %c1 = arith.constant 1 : index
    %76 = arith.index_cast %5 : i32 to index
    %77 = vector.load %arg1[%c1, %76] : memref<2x256xf32, #tpu.memory_space<vmem>>, vector<1x256xf32>
    %cst_27 = arith.constant 0.000000e+00 : f32
    %78 = vector.broadcast %cst_27 : f32 to vector<1x256xf32>
    %79 = arith.subf %77, %78 : vector<1x256xf32>
    %cst_28 = arith.constant 8.000000e+00 : f32
    %80 = vector.broadcast %cst_28 : f32 to vector<1x256xf32>
    %81 = arith.mulf %79, %80 : vector<1x256xf32>
    %cst_29 = arith.constant 0.000000e+00 : f32
    %cst_30 = arith.constant 7.99999904 : f32
    %82 = vector.broadcast %cst_29 : f32 to vector<1x256xf32>
    %83 = arith.maximumf %82, %81 : vector<1x256xf32>
    %84 = vector.broadcast %cst_30 : f32 to vector<1x256xf32>
    %85 = arith.minimumf %84, %83 : vector<1x256xf32>
    %86 = math.floor %85 : vector<1x256xf32>
    %cst_31 = arith.constant 7.000000e+00 : f32
    %87 = vector.broadcast %cst_31 : f32 to vector<1x256xf32>
    %88 = arith.minimumf %86, %87 : vector<1x256xf32>
    %89 = arith.subf %85, %88 : vector<1x256xf32>
    %cst_32 = arith.constant 2.000000e+00 : f32
    %90 = vector.broadcast %cst_32 : f32 to vector<1x256xf32>
    %91 = arith.mulf %89, %90 : vector<1x256xf32>
    %92 = arith.fptosi %88 : vector<1x256xf32> to vector<1x256xi32>
    %c2_i32_33 = arith.constant 2 : i32
    %93 = vector.broadcast %c2_i32_33 : i32 to vector<1x256xi32>
    %94 = arith.muli %92, %93 : vector<1x256xi32>
    %cst_34 = arith.constant 1.000000e+00 : f32
    %95 = vector.broadcast %cst_34 : f32 to vector<1x256xf32>
    %cst_35 = arith.constant 1.000000e+00 : f32
    %96 = vector.broadcast %cst_35 : f32 to vector<1x256xf32>
    %97 = arith.subf %91, %96 : vector<1x256xf32>
    %cst_36 = arith.constant -1.000000e+00 : f32
    %98 = vector.broadcast %cst_36 : f32 to vector<1x256xf32>
    %99 = arith.mulf %97, %98 : vector<1x256xf32>
    %100 = arith.mulf %95, %99 : vector<1x256xf32>
    %cst_37 = arith.constant 2.000000e+00 : f32
    %101 = vector.broadcast %cst_37 : f32 to vector<1x256xf32>
    %102 = arith.subf %91, %101 : vector<1x256xf32>
    %cst_38 = arith.constant -5.000000e-01 : f32
    %103 = vector.broadcast %cst_38 : f32 to vector<1x256xf32>
    %104 = arith.mulf %102, %103 : vector<1x256xf32>
    %105 = arith.mulf %100, %104 : vector<1x256xf32>
    %cst_39 = arith.constant 1.000000e+00 : f32
    %106 = vector.broadcast %cst_39 : f32 to vector<1x256xf32>
    %cst_40 = arith.constant 0.000000e+00 : f32
    %107 = vector.broadcast %cst_40 : f32 to vector<1x256xf32>
    %108 = arith.subf %91, %107 : vector<1x256xf32>
    %cst_41 = arith.constant 1.000000e+00 : f32
    %109 = vector.broadcast %cst_41 : f32 to vector<1x256xf32>
    %110 = arith.mulf %108, %109 : vector<1x256xf32>
    %111 = arith.mulf %106, %110 : vector<1x256xf32>
    %cst_42 = arith.constant 2.000000e+00 : f32
    %112 = vector.broadcast %cst_42 : f32 to vector<1x256xf32>
    %113 = arith.subf %91, %112 : vector<1x256xf32>
    %cst_43 = arith.constant -1.000000e+00 : f32
    %114 = vector.broadcast %cst_43 : f32 to vector<1x256xf32>
    %115 = arith.mulf %113, %114 : vector<1x256xf32>
    %116 = arith.mulf %111, %115 : vector<1x256xf32>
    %cst_44 = arith.constant 1.000000e+00 : f32
    %117 = vector.broadcast %cst_44 : f32 to vector<1x256xf32>
    %cst_45 = arith.constant 0.000000e+00 : f32
    %118 = vector.broadcast %cst_45 : f32 to vector<1x256xf32>
    %119 = arith.subf %91, %118 : vector<1x256xf32>
    %cst_46 = arith.constant 5.000000e-01 : f32
    %120 = vector.broadcast %cst_46 : f32 to vector<1x256xf32>
    %121 = arith.mulf %119, %120 : vector<1x256xf32>
    %122 = arith.mulf %117, %121 : vector<1x256xf32>
    %cst_47 = arith.constant 1.000000e+00 : f32
    %123 = vector.broadcast %cst_47 : f32 to vector<1x256xf32>
    %124 = arith.subf %91, %123 : vector<1x256xf32>
    %cst_48 = arith.constant 1.000000e+00 : f32
    %125 = vector.broadcast %cst_48 : f32 to vector<1x256xf32>
    %126 = arith.mulf %124, %125 : vector<1x256xf32>
    %127 = arith.mulf %122, %126 : vector<1x256xf32>
    %128 = vector.broadcast %94 : vector<1x256xi32> to vector<32x256xi32>
    %129 = arith.subi %1, %128 : vector<32x256xi32>
    %c0_i32_49 = arith.constant 0 : i32
    %130 = vector.broadcast %c0_i32_49 : i32 to vector<32x256xi32>
    %131 = arith.cmpi eq, %129, %130 : vector<32x256xi32>
    %cst_50 = arith.constant 0.000000e+00 : f32
    %132 = vector.shape_cast %105 : vector<1x256xf32> to vector<1x256xf32>
    %133 = vector.broadcast %132 : vector<1x256xf32> to vector<32x256xf32>
    %134 = vector.broadcast %cst_50 : f32 to vector<32x256xf32>
    %135 = arith.select %131, %133, %134 : vector<32x256xi1>, vector<32x256xf32>
    %c1_i32_51 = arith.constant 1 : i32
    %136 = vector.broadcast %c1_i32_51 : i32 to vector<32x256xi32>
    %137 = arith.cmpi eq, %129, %136 : vector<32x256xi32>
    %138 = vector.shape_cast %116 : vector<1x256xf32> to vector<1x256xf32>
    %139 = vector.broadcast %138 : vector<1x256xf32> to vector<32x256xf32>
    %140 = arith.select %137, %139, %135 : vector<32x256xi1>, vector<32x256xf32>
    %c2_i32_52 = arith.constant 2 : i32
    %141 = vector.broadcast %c2_i32_52 : i32 to vector<32x256xi32>
    %142 = arith.cmpi eq, %129, %141 : vector<32x256xi32>
    %143 = vector.shape_cast %127 : vector<1x256xf32> to vector<1x256xf32>
    %144 = vector.broadcast %143 : vector<1x256xf32> to vector<32x256xf32>
    %145 = arith.select %142, %144, %140 : vector<32x256xi1>, vector<32x256xf32>
    %cst_53 = arith.constant dense<0.000000e+00> : vector<32x256xf32>
    %146 = tpu.matmul %0, %75, %cst_53 {dimension_numbers = #tpu.dot_dimension_numbers<[1], [0], [0], [1], [0, 0, 1, 1], [], []>} : vector<32x32xf32>, vector<32x256xf32>, vector<32x256xf32> -> vector<32x256xf32>
    %147 = arith.mulf %146, %145 : vector<32x256xf32>
    %cst_54 = arith.constant dense<0.000000e+00> : vector<256xf32>
    %148 = vector.multi_reduction <add>, %147, %cst_54 [0] : vector<32x256xf32> to vector<256xf32>
    %149 = vector.shape_cast %148 : vector<256xf32> to vector<1x256xf32>
    %c0_55 = arith.constant 0 : index
    %150 = arith.index_cast %5 : i32 to index
    %151 = vector.load %arg3[%c0_55, %150] : memref<1x256xf32, #tpu.memory_space<vmem>>, vector<1x256xf32>
    tpu.vector_store %arg3[%c0_55, %150], %149 {strides = array<i32>} : memref<1x256xf32, #tpu.memory_space<vmem>>, vector<1x256xf32>,
    %c1_i32_56 = arith.constant 1 : i32
    return
  }
  func.func @transform_0(%arg0: i32) -> (i32, i32) {
    %c0_i32 = arith.constant 0 : i32
    %c0_i32_0 = arith.constant 0 : i32
    return %c0_i32, %arg0 : i32, i32
  }
  func.func @transform_1(%arg0: i32) -> (i32, i32) {
    %c0_i32 = arith.constant 0 : i32
    %c0_i32_0 = arith.constant 0 : i32
    %c0_i32_1 = arith.constant 0 : i32
    return %c0_i32, %c0_i32_0 : i32, i32
  }
  func.func @transform_2(%arg0: i32) -> (i32, i32) {
    %c0_i32 = arith.constant 0 : i32
    %c0_i32_0 = arith.constant 0 : i32
    return %c0_i32, %arg0 : i32, i32
  }
}

</mosaic_0001>

<bundles_post_ra>
// kernel: tpu_custom_call.1
= control target key start
LH: loop header
LB: loop body
LE: loop exit
PB: predicated region body
PF: predicated region fallthrough
CT: control target
= control target key end

     0   :  { %7 = vsyncpa [#allocation3], 0  ;;  %s1146_s0 = inlined_call_operand.hbm [shape: f32[2,512], index: 0, kind: input, shape index: {}]   ;;  %s1147_s1 = inlined_call_operand.hbm [shape: f32[32,32], index: 1, kind: input, shape index: {}]   ;;  %s1148_s2 = inlined_call_operand.hbm [shape: f32[1,512], index: 2, kind: output, shape index: {}]  }
   0x1   :  { %9 = vsyncpa [#allocation3 + $0x1], 0 }
   0x2   :  { %10 = vsyncpa [#allocation6], 0 }
   0x3   :  { %11 = vsyncpa [#allocation4], 0 }
   0x4   :  { %13 = vsyncpa [#allocation4 + $0x1], 0  ;;  %s911_s9 = smov 0   ;;  %s913_s10 = smov 0  }
   0x5   :  { %s915_s11 = smov 0   ;;  %s917_s12 = smov 0  }
   0x6 LB: > { %s932_s13 = sadd.s32 4294967295, %s887_s12   ;;  %s665_s14 = sadd.s32 4294967294, %s887_s12   ;;  %s887_s12 = sphi %s917_s12, %s1170_s12   ;;  %s883_s11 = sphi %s915_s11, %s1169_s11   ;;  %s879_s10 = sphi %s913_s10, %s1168_s10   ;;  %s875_s9 = sphi %s911_s9, %s1167_s9  }
   0x7   : > { %p39_p0 = scmp.ne.s32.totalorder %s879_s10, %s875_s9  ;;  %p1149_p1 = scmp.eq.s32.totalorder %s932_s13, 0 }
   0x8   : > { %p90_p3 = scmp.eq.s32.totalorder %s665_s14, 1  ;;  %p666_p5 = scmp.ge.s32.totalorder %s887_s12, 1 }
   0x9   : > { %p941_p4 = por %p1149_p1, %p39_p0  ;;  %p97_p7 = scmp.lt.s32.totalorder %s887_s12, 3 }
   0xa   : > { %p946_p6 = por %p90_p3, %p39_p0  ;;  %s889_s18 = smov [#allocation5]  }
   0xb   : > { %s1153_s15 = scalar_select %p941_p4, 1, 0 }
   0xc   : > { %s1154_s16 = scalar_select %p946_p6, 1, 0 }
   0xd   : > { %p951_p8 = pnand %p666_p5, %p97_p7  ;;  %s109_s19 = sshll.u32 %s889_s18, 4  ;;  %s110_s19 = int_to_ptr.vmem [resolvable:$true] %s109_s19 }
   0xe   : > { %s965_s21 = sadd.s32 1, %s887_s12   ;;  %s26_s22 = sadd.s32 1, %s883_s11 }
   0xf   : > { %s1155_s17 = scalar_select %p951_p8, 1, 0 }
  0x10   : > { %p712_p9 = pneg %p951_p8  ;;  %s23_s23 = ssub.s32 %s887_s12, %s965_s21 }
  0x11   : > { %s776_s24 = scalar_lea.vmem %s110_s19, 512  ;;  %p784_p5 = scmp.lt.s32.totalorder %s110_s19, %s110_s19 }
  0x12   : > { %p960_p11 = pnand %p712_p9, %p1149_p1  ;;  %p777_p13 = scmp.ne.s32.totalorder %s110_s19, %s776_s24 }
  0x13   : > { %p785_p7 = scmp.lt.s32.totalorder %s776_s24, %s776_s24 }
  0x14   : > { %p767_p12 = pneg %p960_p11 }
  0x15   : > { %p786_p10 = por %p785_p7, %p784_p5 }
  0x16   : > { %p779_p0 = pnand %p777_p13, %p767_p12 }
  0x18   : > { %p780_p3 = pneg %p779_p0 }
  0x1a   : > { %p787_p2 = pnand %p786_p10, %p780_p3 }
  0x1c   : > { %790 = shalt.err (!%p787_p2)
}
  0x1d   : > { %s890_s25 = smov 128   ;;  %s891_s26 = smov 8  }
  0x1e   : > { %715 = dma.hbm_to_vmem [thread:$0]  (!%p960_p11), %s1147_s1, 512, %s110_s19, [#allocation6], %s890_s25, %s890_s25, %s891_s26  }
  0x1f   : > { %p24_p9 = scmp.eq.s32.totalorder %s23_s23, 0  ;;  %p33_p12 = scmp.ne.s32.totalorder %s883_s11, %s879_s10 }
  0x20   : > { %p34_p10 = scmp.eq.s32.totalorder %s887_s12, 0  ;;  %p725_p2 = scmp.lt.s32.totalorder %s887_s12, 2 }
  0x21   : > { %s982_s29 = scalar_select %p24_p9, %s883_s11, %s26_s22  }
  0x22   : > { %p35_p13 = por %p34_p10, %p33_p12  ;;  %p1157_p0 = scmp.eq.s32.totalorder %s932_s13, 1 }
  0x23   : > { %s123_s3 = sand.u32 1, %s883_s11   ;;  %s690_s4 = sshll.u32 %s887_s12, 6 }
  0x24   : > { %p986_p3 = por %p1157_p0, %p33_p12  ;;  %s669_s5 = sshll.u32 %s123_s3, 2 }
  0x25   : > { %s995_s8 = scalar_lea.hbm %s1146_s0, %s690_s4  ;;  %s127_s14 = scalar_lea.vmem [#allocation2], %s669_s5 }
  0x26   : > { %s1158_s30 = scalar_select %p986_p3, 1, 0 }
  0x27   : > { %s135_s18 = sshll.u32 %s127_s14, 4  ;;  %p997_p11 = pnand %p725_p2, %p35_p13  ;;  %s136_s18 = int_to_ptr.vmem [resolvable:$true] %s135_s18 }
  0x28   : > { %s124_s20 = scalar_lea.sflag [#allocation3], %s123_s3  ;;  %s791_s22 = scalar_lea.hbm %s995_s8, 64 }
  0x29   : > { %p792_p5 = scmp.ne.s32.totalorder %s995_s8, %s791_s22  ;;  %p793_p7 = pneg %p997_p11 }
  0x2a   : > { %s796_s25 = scalar_lea.hbm %s1146_s0, 128  ;;  %p797_p10 = scmp.lt.s32.totalorder %s995_s8, %s1146_s0 }
  0x2b   : > { %p794_p9 = pnand %p793_p7, %p792_p5  ;;  %p798_p2 = scmp.lt.s32.totalorder %s796_s25, %s791_s22 }
  0x2d   : > { %p795_p12 = pneg %p794_p9  ;;  %p799_p13 = por %p798_p2, %p797_p10 }
  0x2f   : > { %p800_p0 = pnand %p799_p13, %p795_p12 }
  0x31   : > { %803 = shalt.err (!%p800_p0)
}
  0x32   : > { %s804_s28 = scalar_lea.vmem %s136_s18, 64  ;;  %s892_s3 = smov [#allocation2]  }
  0x33   : > { %p805_p1 = scmp.ne.s32.totalorder %s136_s18, %s804_s28  ;;  %s809_s4 = sshll.u32 %s892_s3, 4  ;;  %s810_s4 = int_to_ptr.vmem [resolvable:$false] %s809_s4 }
  0x34   : > { %s811_s5 = scalar_lea.vmem %s810_s4, 128  ;;  %p812_p5 = scmp.lt.s32.totalorder %s136_s18, %s810_s4 }
  0x35   : > { %p807_p6 = pnand %p805_p1, %p793_p7  ;;  %p813_p9 = scmp.lt.s32.totalorder %s811_s5, %s804_s28 }
  0x37   : > { %p808_p3 = pneg %p807_p6  ;;  %p814_p4 = por %p813_p9, %p812_p5 }
  0x39   : > { %p815_p8 = pnand %p814_p4, %p808_p3 }
  0x3b   : > { %818 = shalt.err (!%p815_p8)
}
  0x3c   : > { %719 = dma.hbm_to_vmem [thread:$0]  (!%p997_p11), %s995_s8, 64, %s136_s18, %s124_s20  }
  0x3d   : > { %p1160_p12 = scmp.ne.s32.totalorder %s1155_s17, 0 }
  0x3e   : > { %s1018_s6 = sand.u32 (!%p1160_p12), 1, %s879_s10   ;;  %p1161_p1 = scmp.ne.s32.totalorder (!%p1160_p12), %s1153_s15, 0 }
  0x3f   : > { %144 = sbr.rel (%p1160_p12) target bundleno = 348 (0x15c), region = 28  ;;  %s673_s7 = sshll.u32 (!%p1160_p12), %s1018_s6, 2 }
  0x40   : > { %s147_s14 = scalar_lea.sflag (!%p1160_p12), [#allocation3], %s1018_s6  ;;  %s1022_s22 = scalar_lea.vmem (!%p1160_p12), [#allocation2], %s673_s7 }
  0x44   : > { %862 = dma.done.wait (%p1161_p1), %s147_s14, 64  }
  0x45   : > { %864 = vsyncadd (%p1161_p1), %s147_s14, 4294967232  ;;  %p1162_p4 = scmp.eq.s32.totalorder %s932_s13, 0 }
  0x47   : > { %866 = dma.done.wait (%p1162_p4), [#allocation6], 512   ;;  %p1163_p6 = pmov %p1162_p4 }
  0x48   : > { %v893_v0 = vmov 0.0   ;;  %v186_v1 = vld [vmem:[%s1022_s22] ss:$2 sm:$0x3]  ;;  %v181_v5 = vlaneseq  ;;  %s675_s15 = sshll.u32 %s1018_s6, 1  ;;  %s691_s17 = sshll.u32 %s932_s13, 5 }
  0x49   : > { %868 = vsyncadd (%p1163_p6), [#allocation6], 4294966784  ;;  %496 = vmatprep.mubr.f32.mxu0 %v893_v0  ;;  %508 = vmatprep.mubr.f32.mxu1 %v893_v0  ;;  %v187_v2 = vmul.f32 8.0, %v186_v1  ;;  %s174_s8 = scalar_lea.vmem [#allocation7], %s675_s15  ;;  %s583_s23 = scalar_lea.hbm %s1148_s2, %s691_s17 }
  0x4a   : > { %v1036_v8 = vshrl.u32 %v181_v5, 7  ;;  %s585_s18 = sshll.u32 %s174_s8, 4  ;;  %s571_s24 = scalar_lea.sflag [#allocation4], %s1018_s6  ;;  %s586_s18 = int_to_ptr.vmem [resolvable:$true] %s585_s18 }
  0x4b   : > { %v188_v3 = vmax.f32 %v187_v2, 0.0  ;;  %s819_s25 = scalar_lea.vmem %s586_s18, 32  ;;  %p1164_p3 = scmp.ne.s32.totalorder %s1158_s30, 0 }
  0x4c   : > { %v1039_v13 = vsub.s32 1, %v1036_v8  ;;  %v1042_v14 = vsub.s32 0, %v1036_v8  ;;  %v1045_v19 = vadd.s32 24, %v1036_v8  ;;  %v1048_v20 = vadd.s32 16, %v1036_v8  ;;  %p820_p8 = scmp.ne.s32.totalorder %s586_s18, %s819_s25  ;;  %s895_s26 = smov [#allocation7]  }
  0x4d   : > { %v189_v4 = vmin.f32 %v188_v3, 7.999999  ;;  %v1053_v27 = vadd.s32 8, %v1036_v8  ;;  %s823_s13 = sshll.u32 %s895_s26, 4  ;;  %s824_s13 = int_to_ptr.vmem [resolvable:$false] %s823_s13 }
  0x4e   : > { %p821_p11 = pnand %p820_p8, %p1164_p3  ;;  %s825_s27 = scalar_lea.vmem %s824_s13, 64 }
  0x4f   : > { %v190_v6 = vfloor.f32 %v189_v4  ;;  %p826_p10 = scmp.lt.s32.totalorder %s586_s18, %s824_s13  ;;  %p827_p2 = scmp.lt.s32.totalorder %s825_s27, %s819_s25 }
  0x50   : > { %p822_p7 = pneg %p821_p11 }
  0x51   : > { %v191_v7 = vmin.f32 %v190_v6, 7.0  ;;  %v179_v6 = vld [vmem:[#allocation5 + $0x10] sm:$0xff]  ;;  %p828_p13 = por %p827_p2, %p826_p10 }
  0x53   : > { %v192_v9 = vsub.f32 %v189_v4, %v191_v7  ;;  %v700_v10 = vtrunc.f32 %v191_v7  ;;  %v177_v4 = vld [vmem:[#allocation5] sm:$0xff]  ;;  %p829_p0 = pnand %p828_p13, %p822_p7 }
  0x55   : > { %v193_v11 = vmul.f32 2.0, %v192_v9  ;;  %v701_v12 = vcvt.f32.s32 %v700_v10  ;;  %v178_v9 = vld [vmem:[#allocation5 + $0x8] sm:$0xff]  ;;  %v180_v10 = vld [vmem:[#allocation5 + $0x18] sm:$0xff] }
  0x57   : > { %v195_v15 = vmul.u32 2, %v701_v12  ;;  %v676_v16 = vadd.f32 -1.0, %v193_v11  ;;  %v677_v17 = vadd.f32 -2.0, %v193_v11  ;;  %v203_v18 = vmul.f32 0.5, %v193_v11 }
  0x59   : > { %v197_v21 = vmul.f32 -1.0, %v676_v16  ;;  %v199_v22 = vmul.f32 -0.5, %v677_v17  ;;  %v201_v23 = vmul.f32 -1.0, %v677_v17  ;;  %v204_v24 = vmul.f32 %v676_v16, %v203_v18 }
  0x5a   : > { %v212_v25 = vrot.slane %v195_v15, %v1039_v13  ;;  %v208_v26 = vrot.slane %v195_v15, %v1042_v14 }
  0x5b   : > { %v200_v28 = vmul.f32 %v199_v22, %v197_v21  ;;  %v202_v29 = vmul.f32 %v201_v23, %v193_v11  ;;  %v1056_v30 = vrot.slane %v204_v24, %v1039_v13  ;;  %v1059_v31 = vrot.slane %v204_v24, %v1042_v14  ;;  %v678_v11 = vld [vmem:[%s1022_s22 + $0x1] ss:$2 sm:$0x3] }
  0x5c   : > { %v220_v32 = vsub.s32 %v1045_v19, %v212_v25  ;;  %v219_v33 = vsub.s32 %v1045_v19, %v208_v26  ;;  %v218_v34 = vsub.s32 %v1048_v20, %v212_v25  ;;  %v217_v35 = vsub.s32 %v1048_v20, %v208_v26 }
  0x5d   : > { %v237_v36 = vrot.slane %v200_v28, %v1039_v13  ;;  %v264_v37 = vrot.slane %v202_v29, %v1039_v13  ;;  %v233_v38 = vrot.slane %v200_v28, %v1042_v14  ;;  %v1069_v39 = vrot.slane %v202_v29, %v1042_v14 }
  0x5e   : > { %vm228_vm0 = vcmp.eq.s32.totalorder %v220_v32, 0  ;;  %vm255_vm1 = vcmp.eq.s32.totalorder %v220_v32, 1  ;;  %vm282_vm2 = vcmp.eq.s32.totalorder %v220_v32, 2  ;;  %vm227_vm3 = vcmp.eq.s32.totalorder %v219_v33, 0 }
  0x5f   : > { %v247_v40 = vsel %vm228_vm0, %v237_v36, 0.0  ;;  %v246_v41 = vsel %vm227_vm3, %v233_v38, 0.0  ;;  %vm254_vm4 = vcmp.eq.s32.totalorder %v219_v33, 1  ;;  %vm281_vm5 = vcmp.eq.s32.totalorder %v219_v33, 2 }
  0x60   : > { %v274_v42 = vsel %vm255_vm1, %v264_v37, %v247_v40  ;;  %v273_v43 = vsel %vm254_vm4, %v1069_v39, %v246_v41  ;;  %vm226_vm6 = vcmp.eq.s32.totalorder %v218_v34, 0  ;;  %vm253_vm7 = vcmp.eq.s32.totalorder %v218_v34, 1 }
  0x61   : > { %v301_v44 = vsel %vm282_vm2, %v1056_v30, %v274_v42  ;;  %v300_v45 = vsel %vm281_vm5, %v1059_v31, %v273_v43  ;;  %v245_v46 = vsel %vm226_vm6, %v237_v36, 0.0  ;;  %vm280_vm8 = vcmp.eq.s32.totalorder %v218_v34, 2 }
  0x62   : > { %456 = vmatprep.subr.mxu0 %v301_v44  ;;  %692 = vmatprep.subr.mxu1 %v301_v44  ;;  %v272_v47 = vsel %vm253_vm7, %v264_v37, %v245_v46  ;;  %vm225_vm9 = vcmp.eq.s32.totalorder %v217_v35, 0  ;;  %vm252_vm10 = vcmp.eq.s32.totalorder %v217_v35, 1  ;;  %vm279_vm11 = vcmp.eq.s32.totalorder %v217_v35, 2 }
  0x63   : > { %457 = vmatpush1.msra.mxu0 %v300_v45  ;;  %v299_v48 = vsel %vm280_vm8, %v1056_v30, %v272_v47  ;;  %696 = vmatpush1.msra.mxu1 %v300_v45  ;;  %v244_v49 = vsel %vm225_vm9, %v233_v38, 0.0  ;;  %v216_v50 = vsub.s32 %v1053_v27, %v212_v25  ;;  %v215_v51 = vsub.s32 %v1053_v27, %v208_v26 }
  0x64   : > { %458 = vmatprep.subr.mxu0 %v299_v48  ;;  %v271_v52 = vsel %vm252_vm10, %v1069_v39, %v244_v49  ;;  %693 = vmatprep.subr.mxu1 %v299_v48  ;;  %v214_v53 = vsub.s32 %v1036_v8, %v212_v25  ;;  %v213_v54 = vsub.s32 %v1036_v8, %v208_v26  ;;  %vm419_vm8 = vcmask 261120  }
  0x65   : > { %v298_v55 = vsel %vm279_vm11, %v1059_v31, %v271_v52  ;;  %vm224_vm12 = vcmp.eq.s32.totalorder %v216_v50, 0  ;;  %vm251_vm13 = vcmp.eq.s32.totalorder %v216_v50, 1  ;;  %vm278_vm14 = vcmp.eq.s32.totalorder %v216_v50, 2 }
  0x66   : > { %459 = vmatpush1.msra.mxu0 %v298_v55  ;;  %v243_v56 = vsel %vm224_vm12, %v237_v36, 0.0  ;;  %697 = vmatpush1.msra.mxu1 %v298_v55  ;;  %vm223_vm15 = vcmp.eq.s32.totalorder %v215_v51, 0  ;;  %vm250_vm0 = vcmp.eq.s32.totalorder %v215_v51, 1  ;;  %vm277_vm1 = vcmp.eq.s32.totalorder %v215_v51, 2 }
  0x67   : > { %v270_v57 = vsel %vm251_vm13, %v264_v37, %v243_v56  ;;  %v242_v58 = vsel %vm223_vm15, %v233_v38, 0.0  ;;  %vm222_vm2 = vcmp.eq.s32.totalorder %v214_v53, 0  ;;  %vm249_vm3 = vcmp.eq.s32.totalorder %v214_v53, 1 }
  0x68   : > { %v297_v59 = vsel %vm278_vm14, %v1056_v30, %v270_v57  ;;  %v269_v60 = vsel %vm250_vm0, %v1069_v39, %v242_v58  ;;  %v241_v61 = vsel %vm222_vm2, %v237_v36, 0.0  ;;  %vm276_vm4 = vcmp.eq.s32.totalorder %v214_v53, 2 }
  0x69   : > { %460 = vmatprep.subr.mxu0 %v297_v59  ;;  %v296_v62 = vsel %vm277_vm1, %v1059_v31, %v269_v60  ;;  %694 = vmatprep.subr.mxu1 %v297_v59  ;;  %v268_v63 = vsel %vm249_vm3, %v264_v37, %v241_v61  ;;  %vm221_vm5 = vcmp.eq.s32.totalorder %v213_v54, 0  ;;  %vm248_vm6 = vcmp.eq.s32.totalorder %v213_v54, 1 }
  0x6a   : > { %461 = vmatpush1.msra.mxu0 %v296_v62  ;;  %v295_v1 = vsel %vm276_vm4, %v1056_v30, %v268_v63  ;;  %698 = vmatpush1.msra.mxu1 %v296_v62  ;;  %v240_v2 = vsel %vm221_vm5, %v233_v38, 0.0  ;;  %vm275_vm7 = vcmp.eq.s32.totalorder %v213_v54, 2  ;;  %v304_v12 = vmul.f32 8.0, %v678_v11 }
  0x6b   : > { %462 = vmatprep.subr.mxu0 %v295_v1  ;;  %v267_v3 = vsel %vm248_vm6, %v1069_v39, %v240_v2  ;;  %695 = vmatprep.subr.mxu1 %v295_v1 }
  0x6c   : > { %v294_v7 = vsel %vm275_vm7, %v1059_v31, %v267_v3  ;;  %v305_v15 = vmax.f32 %v304_v12, 0.0 }
  0x6d   : > { %463 = vmatpush1.msra.mxu0 %v294_v7  ;;  %699 = vmatpush1.msra.mxu1 %v294_v7 }
  0x6e   : > { %681 = vmatmul.mubr.msk.f32.vlgmr.msra.gmra.mxu0 %vm419_vm8, %v177_v4  ;;  %683 = vmatmul.mubr.msk.f32.vlgmr.msra.gmra.mxu1 %vm419_vm8, %v179_v6  ;;  %v306_v16 = vmin.f32 %v305_v15, 7.999999 }
  0x6f   : > { %502 = vmatprep.mubr.f32.mxu0 %v893_v0  ;;  %514 = vmatprep.mubr.f32.mxu1 %v893_v0 }
  0x70   : > { %v307_v17 = vfloor.f32 %v306_v16 }
  0x72   : > { %682 = vmatmul.mubr.msk.f32.gmra.mxu0 %vm419_vm8, %v178_v9  ;;  %684 = vmatmul.mubr.msk.f32.gmra.mxu1 %vm419_vm8, %v180_v10  ;;  %v308_v18 = vmin.f32 %v307_v17, 7.0 }
  0x74   : > { %v309_v21 = vsub.f32 %v306_v16, %v308_v18  ;;  %v702_v22 = vtrunc.f32 %v308_v18 }
  0x76   : > { %v310_v23 = vmul.f32 2.0, %v309_v21  ;;  %v703_v24 = vcvt.f32.s32 %v702_v22 }
  0x78   : > { %v679_v25 = vadd.f32 -1.0, %v310_v23  ;;  %v680_v26 = vadd.f32 -2.0, %v310_v23  ;;  %v312_v28 = vmul.u32 2, %v703_v24  ;;  %v320_v34 = vmul.f32 0.5, %v310_v23 }
  0x7a   : > { %v314_v29 = vmul.f32 -1.0, %v679_v25  ;;  %v316_v30 = vmul.f32 -0.5, %v680_v26  ;;  %v325_v0 = vrot.slane %v312_v28, %v1042_v14  ;;  %v329_v31 = vrot.slane %v312_v28, %v1039_v13 }
  0x7b   : > { %v318_v32 = vmul.f32 -1.0, %v680_v26  ;;  %v321_v40 = vmul.f32 %v679_v25, %v320_v34 }
  0x7c   : > { %v317_v33 = vmul.f32 %v316_v30, %v314_v29  ;;  %v330_v35 = vsub.s32 %v1036_v8, %v325_v0  ;;  %v331_v36 = vsub.s32 %v1036_v8, %v329_v31  ;;  %v332_v39 = vsub.s32 %v1053_v27, %v325_v0 }
  0x7d   : > { %v319_v37 = vmul.f32 %v318_v32, %v310_v23  ;;  %v334_v42 = vsub.s32 %v1048_v20, %v325_v0  ;;  %v333_v43 = vsub.s32 %v1053_v27, %v329_v31  ;;  %v336_v44 = vsub.s32 %v1045_v19, %v325_v0 }
  0x7e   : > { %v350_v38 = vrot.slane %v317_v33, %v1042_v14  ;;  %vm338_vm9 = vcmp.eq.s32.totalorder %v330_v35, 0  ;;  %v354_v41 = vrot.slane %v317_v33, %v1039_v13  ;;  %vm339_vm10 = vcmp.eq.s32.totalorder %v331_v36, 0 }
  0x7f   : > { %vm365_vm11 = vcmp.eq.s32.totalorder %v330_v35, 1  ;;  %v377_v45 = vrot.slane %v319_v37, %v1042_v14  ;;  %v381_v47 = vrot.slane %v319_v37, %v1039_v13  ;;  %vm340_vm12 = vcmp.eq.s32.totalorder %v332_v39, 0 }
  0x80   : > { %v357_v46 = vsel %vm338_vm9, %v350_v38, 0.0  ;;  %v335_v48 = vsub.s32 %v1048_v20, %v329_v31  ;;  %v404_v49 = vrot.slane %v321_v40, %v1042_v14  ;;  %v358_v50 = vsel %vm339_vm10, %v354_v41, 0.0 }
  0x81   : > { %vm366_vm13 = vcmp.eq.s32.totalorder %v331_v36, 1  ;;  %vm342_vm14 = vcmp.eq.s32.totalorder %v334_v42, 0  ;;  %vm392_vm15 = vcmp.eq.s32.totalorder %v330_v35, 2  ;;  %vm341_vm0 = vcmp.eq.s32.totalorder %v333_v43, 0 }
  0x82   : > { %vm344_vm1 = vcmp.eq.s32.totalorder %v336_v44, 0  ;;  %v337_v27 = vsub.s32 %v1045_v19, %v329_v31  ;;  %v384_v51 = vsel %vm365_vm11, %v377_v45, %v357_v46  ;;  %v408_v52 = vrot.slane %v321_v40, %v1039_v13 }
  0x83   : > { %v359_v53 = vsel %vm340_vm12, %v350_v38, 0.0  ;;  %vm367_vm2 = vcmp.eq.s32.totalorder %v332_v39, 1  ;;  %v385_v54 = vsel %vm366_vm13, %v381_v47, %v358_v50  ;;  %v361_v55 = vsel %vm342_vm14, %v350_v38, 0.0 }
  0x84   : > { %vm369_vm3 = vcmp.eq.s32.totalorder %v334_v42, 1  ;;  %vm343_vm4 = vcmp.eq.s32.totalorder %v335_v48, 0  ;;  %v360_v20 = vsel %vm341_vm0, %v354_v41, 0.0  ;;  %vm368_vm5 = vcmp.eq.s32.totalorder %v333_v43, 1 }
  0x85   : > { %v363_v14 = vsel %vm344_vm1, %v350_v38, 0.0  ;;  %vm371_vm6 = vcmp.eq.s32.totalorder %v336_v44, 1  ;;  %vm393_vm7 = vcmp.eq.s32.totalorder %v331_v36, 2  ;;  %v386_v56 = vsel %vm367_vm2, %v377_v45, %v359_v53 }
  0x86   : > { %vm394_vm8 = vcmp.eq.s32.totalorder %v332_v39, 2  ;;  %vm345_vm9 = vcmp.eq.s32.totalorder %v337_v27, 0  ;;  %v388_v58 = vsel %vm369_vm3, %v377_v45, %v361_v55  ;;  %vm396_vm10 = vcmp.eq.s32.totalorder %v334_v42, 2 }
  0x87   : > { %v362_v59 = vsel %vm343_vm4, %v354_v41, 0.0  ;;  %vm370_vm11 = vcmp.eq.s32.totalorder %v335_v48, 1  ;;  %v387_v13 = vsel %vm368_vm5, %v381_v47, %v360_v20  ;;  %vm395_vm12 = vcmp.eq.s32.totalorder %v333_v43, 2 }
  0x88   : > { %v390_v60 = vsel %vm371_vm6, %v377_v45, %v363_v14  ;;  %vm398_vm13 = vcmp.eq.s32.totalorder %v336_v44, 2  ;;  %v411_v61 = vsel %vm392_vm15, %v404_v49, %v384_v51  ;;  %v413_v63 = vsel %vm394_vm8, %v404_v49, %v386_v56 }
  0x89   : > { %v364_v2 = vsel %vm345_vm9, %v354_v41, 0.0  ;;  %vm372_vm14 = vcmp.eq.s32.totalorder %v337_v27, 1  ;;  %v415_v3 = vsel %vm396_vm10, %v404_v49, %v388_v58  ;;  %v389_v4 = vsel %vm370_vm11, %v381_v47, %v362_v59 }
  0x8a   : > { %vm397_vm0 = vcmp.eq.s32.totalorder %v335_v48, 2  ;;  %v412_v6 = vsel %vm393_vm7, %v408_v52, %v385_v54  ;;  %v414_v9 = vsel %vm395_vm12, %v408_v52, %v387_v13  ;;  %v417_v10 = vsel %vm398_vm13, %v404_v49, %v390_v60 }
  0x8b   : > { %v391_v16 = vsel %vm372_vm14, %v381_v47, %v364_v2  ;;  %vm399_vm1 = vcmp.eq.s32.totalorder %v337_v27, 2  ;;  %v416_v18 = vsel %vm397_vm0, %v408_v52, %v389_v4  ;;  %v894_v40 = vmov 1966171168  }
  0x8c   : > { %v418_v26 = vsel %vm399_vm1, %v408_v52, %v391_v16  ;;  %v551_v41 = vunpack.c.l.s4 %v894_v40  ;;  %vm567_vm15 = vcmp.lt.s32.totalorder %v181_v5, 256 }
  0x8e   : > { %v552_v46 = vunpack.c.0.s8 %v551_v41 }
  0x90   : > { %v555_v50 = vsub.s32 %v552_v46, %v1036_v8 }
 0x12e   : > { %v498_v57 = vpop.f32.mrf.mxu0  ;;  %v510_v19 = vpop.f32.mrf.mxu1 }
 0x12f   : > { %v521_v12 = vmul.f32 %v498_v57, %v411_v61  ;;  %v525_v17 = vmul.f32 %v510_v19, %v415_v3 }
 0x130   : > { %v500_v62 = vpop.f32.mrf.mxu0  ;;  %v512_v1 = vpop.f32.mrf.mxu1 }
 0x131   : > { %v522_v22 = vmul.f32 %v500_v62, %v412_v6  ;;  %v526_v29 = vmul.f32 %v512_v1, %v416_v18 }
 0x132   : > { %v504_v7 = vpop.f32.mrf.mxu0  ;;  %v516_v11 = vpop.f32.mrf.mxu1 }
 0x133   : > { %v523_v15 = vmul.f32 %v504_v7, %v413_v63  ;;  %v527_v25 = vmul.f32 %v516_v11, %v417_v10 }
 0x134   : > { %v506_v21 = vpop.f32.mrf.mxu0  ;;  %v518_v28 = vpop.f32.mrf.mxu1 }
 0x135   : > { %v529_v23 = vadd.f32 %v523_v15, %v521_v12  ;;  %v524_v24 = vmul.f32 %v506_v21, %v414_v9  ;;  %v528_v32 = vmul.f32 %v518_v28, %v418_v26 }
 0x137   : > { %v538_v30 = vadd.f32 %v524_v24, %v522_v22  ;;  %v530_v0 = vadd.f32 %v529_v23, %v525_v17 }
 0x139   : > { %v531_v31 = vadd.f32 %v530_v0, %v527_v25  ;;  %v539_v33 = vadd.f32 %v538_v30, %v526_v29 }
 0x13b   : > { %v532_v34 = vrot.slane %v531_v31, 4  ;;  %v540_v35 = vadd.f32 %v539_v33, %v528_v32 }
 0x13d   : > { %v533_v36 = vadd.f32 %v532_v34, %v531_v31  ;;  %v541_v37 = vrot.slane %v540_v35, 4 }
 0x13f   : > { %v534_v38 = vrot.slane %v533_v36, 2  ;;  %v542_v39 = vadd.f32 %v541_v37, %v540_v35 }
 0x141   : > { %v535_v42 = vadd.f32 %v534_v38, %v533_v36  ;;  %v543_v43 = vrot.slane %v542_v39, 2 }
 0x143   : > { %v536_v44 = vrot.slane %v535_v42, 1  ;;  %v544_v45 = vadd.f32 %v543_v43, %v542_v39 }
 0x145   : > { %v545_v47 = vrot.slane %v544_v45, 1  ;;  %v537_v48 = vadd.f32 %v536_v44, %v535_v42 }
 0x147   : > { %v546_v49 = vadd.f32 %v545_v47, %v544_v45 }
 0x149   : > { %v549_v27 = vcombine.low %v537_v48, %v546_v49 }
 0x14b   : > { %v556_v51 = vrot.slane %v549_v27, %v555_v50 }
 0x14d   : > { %v563_v52 = vrot.slane %v556_v51, %v555_v50 }
 0x14f   : > { %569 = vst.msk [vmem:[%s174_s8] sm:$0x3] %vm567_vm15, %v563_v52 }
 0x150   : > { %832 = shalt.err (!%p829_p0)
}
 0x151   : > { %s833_s28 = scalar_lea.hbm %s583_s23, 32  ;;  %s837_s5 = scalar_lea.hbm %s1148_s2, 64 }
 0x152   : > { %p834_p5 = scmp.ne.s32.totalorder %s583_s23, %s833_s28  ;;  %p838_p1 = scmp.lt.s32.totalorder %s583_s23, %s1148_s2 }
 0x153   : > { %p839_p4 = scmp.lt.s32.totalorder %s837_s5, %s833_s28 }
 0x154   : > { %p835_p9 = pnand %p834_p5, %p1164_p3 }
 0x155   : > { %p840_p6 = por %p839_p4, %p838_p1 }
 0x156   : > { %p836_p12 = pneg %p835_p9 }
 0x158   : > { %p841_p8 = pnand %p840_p6, %p836_p12 }
 0x15a   : > { %844 = shalt.err (!%p841_p8)
}
 0x15b   : > { %710 = dma.vmem_to_hbm [thread:$0]  (%p1164_p3), %s586_s18, 32, %s583_s23, %s571_s24  }
 0x15c PF: > { %s597_s14 = sand.u32 1, %s875_s9   ;;  %p1165_p11 = scmp.ne.s32.totalorder %s1154_s16, 0 }
 0x15d   : > { %p1166_p7 = scmp.ge.s32.totalorder %s887_s12, 2  ;;  %s598_s22 = scalar_lea.sflag [#allocation4], %s597_s14 }
 0x15f   : > { %p721_p10 = pnand %p1166_p7, %p1165_p11 }
 0x161   : > { %p722_p2 = pneg %p721_p10 }
 0x163   : > { %870 = dma.done.wait (%p722_p2), %s598_s22, 32  }
 0x164   : > { %872 = vsyncadd (%p722_p2), %s598_s22, 4294967264  ;;  %p16_p13 = scmp.ge.s32.totalorder %s965_s21, 4   ;;  %s1167_s9 = smov %s879_s10 }
 0x165   : > { %s1168_s10 = smov %s883_s11  ;;  %s1169_s11 = smov %s982_s29 }
 0x166   : > { %s1170_s12 = smov %s965_s21  ;;  %18 = sbr.rel (!%p16_p13) target bundleno = 6 (0x6), region = 78 }
 0x16b   :  { %603 = vsyncpa [#allocation3], 1 }
 0x16c   :  { %605 = vsyncpa [#allocation3 + $0x1], 1 }
 0x16d   :  { %606 = vsyncpa [#allocation6], 1 }
 0x16e   :  { %607 = vsyncpa [#allocation4], 1 }
 0x16f   :  { %609 = vsyncpa [#allocation4 + $0x1], 1 }

</bundles_post_ra>
